<compile_context>
chip_gen: v7x
topology: tpu7x:2x2x1
jax: 0.10.0
libtpu: 0.0.40
codegen_flags: <defaults>
</compile_context>

<pallas_src>
import jax
import jax.numpy as jnp
from jax.experimental import pallas as pl
from jax.experimental.pallas import tpu as pltpu

LANE = 128
MAX_TM = 16 * 1024                      # hard cap on the lane tile
VMEM_BUDGET = 20 * 1024 * 1024          # per-step tile budget (portable incl. v7x)
TARGET_STREAM_BYTES = 2 * 1024 * 1024   # streamed bytes per grid step target


def _round_up(x, m):
    return ((x + m - 1) // m) * m


# ----------------------------- Pallas kernel --------------------------------

def attention_gate_kernel(g_ref, x_ref, wg_ref, wx_ref, b_ref, wp_ref, bp_ref,
                          o_ref):
    # Resident (folded) weights.
    wg = wg_ref[...]          # (F_int, F_g)
    wx = wx_ref[...]          # (F_int, F_l)
    b = b_ref[...]            # (F_int, 1)  pre-summed branch biases
    wp = wp_ref[...]          # (F_int, 1)  psi weights (column for sublane reduce)
    bp = bp_ref[...]          # (1, 1)

    # Static unroll over the batch block; every slice is a lane-dense (C, TM).
    for i in range(g_ref.shape[0]):
        g = g_ref[i].astype(jnp.float32)          # (F_g, TM)
        x = x_ref[i].astype(jnp.float32)          # (F_l, TM)

        # 1x1 convs (+ folded BN):  (F_int, TM)
        a = (jnp.dot(wg, g, preferred_element_type=jnp.float32)
             + jnp.dot(wx, x, preferred_element_type=jnp.float32)
             + b)
        a = jnp.maximum(a, 0.0)                   # relu

        # psi: F_int -> 1 as VPU multiply + sublane reduce -> lane-dense (1, TM)
        psi = jax.nn.sigmoid(jnp.sum(a * wp, axis=0, keepdims=True) + bp)

        # Gate the skip connection.
        o_ref[i] = (x * psi).astype(o_ref.dtype)


def attention_gate_pallas(g3, x3, wg, wx, b, wp, bp, *, nb, tm, vmem_limit):
    """g3: (N, F_g, HW), x3: (N, F_l, HW). Partial tiles handled by masking."""
    N, F_g, HW = g3.shape
    _, F_l, _ = x3.shape
    F_int = wg.shape[0]

    grid = (pl.cdiv(N, nb), pl.cdiv(HW, tm))
    resident = lambda r, c: pl.BlockSpec((r, c), lambda bi, ti: (0, 0))

    return pl.pallas_call(
        attention_gate_kernel,
        out_shape=jax.ShapeDtypeStruct((N, F_l, HW), x3.dtype),
        grid_spec=pltpu.PrefetchScalarGridSpec(
            num_scalar_prefetch=0,
            grid=grid,
            in_specs=[
                pl.BlockSpec((nb, F_g, tm), lambda bi, ti: (bi, 0, ti)),  # g
                pl.BlockSpec((nb, F_l, tm), lambda bi, ti: (bi, 0, ti)),  # x
                resident(F_int, F_g),     # Wg (folded)
                resident(F_int, F_l),     # Wx (folded)
                resident(F_int, 1),       # bg + bx (folded)
                resident(F_int, 1),       # Wpsi (folded)
                resident(1, 1),           # bpsi (folded)
            ],
            out_specs=pl.BlockSpec((nb, F_l, tm), lambda bi, ti: (bi, 0, ti)),
        ),
        compiler_params=pltpu.CompilerParams(
            dimension_semantics=("parallel", "parallel"),
            vmem_limit_bytes=vmem_limit),
    )(g3, x3, wg, wx, b, wp, bp)


# ----------------------------- tiling selection ------------------------------

def _select_tiling(N, F_g, F_l, F_int, HW, dtype_bytes):
    """Pick (nb, tm, vmem_limit): large lane tiles + batch folding so each grid
    step streams ~TARGET_STREAM_BYTES, within a portable VMEM budget."""
    hw_cap = _round_up(HW, LANE)
    # Streamed bytes per lane per image: read g + x, write out.
    stream_per_lane = (F_g + 2 * F_l) * dtype_bytes
    # f32 intermediates per lane ('a', dot temps, psi, upcasts) with x2 safety.
    inter_per_lane = 2 * (3 * F_int + F_g + F_l) * 4

    def vmem_per_lane(nb):                     # x2 = double-buffered streamed blocks
        return 2 * nb * stream_per_lane + inter_per_lane

    # Lane tile: as large as VMEM budget / MAX_TM / HW allow, multiple of 128.
    lanes_by_vmem = max(LANE, (VMEM_BUDGET // vmem_per_lane(1)) // LANE * LANE)
    tm = max(LANE, min(MAX_TM, hw_cap, lanes_by_vmem))

    # Batch folding: grow nb until bytes/step hits the target (or VMEM/N bound).
    nb = 1
    while (nb < N
           and nb * tm * stream_per_lane < TARGET_STREAM_BYTES
           and vmem_per_lane(nb + 1) * tm <= VMEM_BUDGET):
        nb += 1

    # v7x: keep >= 2 parallel grid steps so both TensorCores get work.
    steps = -(-N // nb) * -(-HW // tm)
    if steps < 2:
        if nb > 1:
            nb = (nb + 1) // 2
        elif HW > LANE and tm > LANE:
            tm = max(LANE, _round_up(-(-tm // 2), LANE))

    footprint = vmem_per_lane(nb) * tm + 4 * F_int * (F_g + F_l + 4)
    vmem_limit = int(min(max(2 * footprint, 16 << 20), 40 << 20))
    return nb, tm, vmem_limit


# --------------------------- parameter handling ------------------------------

def fold_conv_bn(w, b, gamma, beta, mean, var, eps=1e-5):
    """Fold eval-mode BatchNorm into a 1x1 conv. w: (Cout, Cin), b: (Cout,)."""
    s = gamma / jnp.sqrt(var + eps)
    return w * s[:, None], (b - mean) * s + beta


def fold_attention_gate_params(params, eps=1e-5):
    """Hoisted out of the per-call path: fold BN once at parameter-load time."""
    wg, bg = fold_conv_bn(params["wg_conv"], params["bg_conv"], eps=eps, **params["bn_g"])
    wx, bx = fold_conv_bn(params["wx_conv"], params["bx_conv"], eps=eps, **params["bn_x"])
    wp, bp = fold_conv_bn(params["wp_conv"], params["bp_conv"], eps=eps, **params["bn_psi"])
    F_int = wg.shape[0]
    return dict(wg=wg, wx=wx,
                b=(bg + bx).reshape(F_int, 1),
                wp=wp.reshape(F_int, 1),
                bp=bp.reshape(1, 1))


def make_params(key, F_g, F_l, F_int):
    ks = jax.random.split(key, 9)
    p = {}
    p["wg_conv"] = jax.random.normal(ks[0], (F_int, F_g), jnp.float32) * 0.2
    p["bg_conv"] = jax.random.normal(ks[1], (F_int,), jnp.float32) * 0.1
    p["wx_conv"] = jax.random.normal(ks[2], (F_int, F_l), jnp.float32) * 0.2
    p["bx_conv"] = jax.random.normal(ks[3], (F_int,), jnp.float32) * 0.1
    p["wp_conv"] = jax.random.normal(ks[4], (1, F_int), jnp.float32) * 0.2
    p["bp_conv"] = jax.random.normal(ks[5], (1,), jnp.float32) * 0.1

    def bn(k, c):
        k1, k2, k3, k4 = jax.random.split(k, 4)
        return dict(
            gamma=1.0 + 0.1 * jax.random.normal(k1, (c,), jnp.float32),
            beta=0.1 * jax.random.normal(k2, (c,), jnp.float32),
            mean=0.1 * jax.random.normal(k3, (c,), jnp.float32),
            var=0.5 + jnp.abs(jax.random.normal(k4, (c,), jnp.float32)),
        )
    p["bn_g"] = bn(ks[6], F_int)
    p["bn_x"] = bn(ks[7], F_int)
    p["bn_psi"] = bn(ks[8], 1)
    return p


# ------------------------------- forward pass --------------------------------

def _attention_gate_fwd(g_nchw, x_nchw, folded):
    N, F_g, H, W = g_nchw.shape
    _, F_l, _, _ = x_nchw.shape
    HW = H * W
    F_int = folded["wg"].shape[0]
    dtype_bytes = jnp.dtype(x_nchw.dtype).itemsize

    nb, tm, vmem_limit = _select_tiling(N, F_g, F_l, F_int, HW, dtype_bytes)

    # NCHW -> (N, C, HW) is a free reshape (no transpose, no extra HBM traffic).
    g3 = g_nchw.reshape(N, F_g, HW)
    x3 = x_nchw.reshape(N, F_l, HW)

    out3 = attention_gate_pallas(g3, x3, folded["wg"], folded["wx"],
                                 folded["b"], folded["wp"], folded["bp"],
                                 nb=nb, tm=tm, vmem_limit=vmem_limit)
    return out3.reshape(N, F_l, H, W)


attention_gate = jax.jit(_attention_gate_fwd)


# Pure-JAX reference (unfolded BN, NCHW) for correctness checking.
def attention_gate_ref(g_nchw, x_nchw, params, eps=1e-5):
    def conv1x1(x, w, b):
        y = jnp.einsum("nchw,dc->ndhw", x, w)
        return y + b[None, :, None, None]

    def bn(x, bnp):
        g, b, m, v = bnp["gamma"], bnp["beta"], bnp["mean"], bnp["var"]
        return (x - m[None, :, None, None]) / jnp.sqrt(v + eps)[None, :, None, None] \
            * g[None, :, None, None] + b[None, :, None, None]

    g1 = bn(conv1x1(g_nchw, params["wg_conv"], params["bg_conv"]), params["bn_g"])
    x1 = bn(conv1x1(x_nchw, params["wx_conv"], params["bx_conv"]), params["bn_x"])
    psi = jnp.maximum(g1 + x1, 0.0)
    psi = jax.nn.sigmoid(bn(conv1x1(psi, params["wp_conv"], params["bp_conv"]),
                            params["bn_psi"]))
    return x_nchw * psi


if __name__ == "__main__":
    key = jax.random.PRNGKey(0)
    k_g, k_x, k_p, k_g2, k_x2, k_g3, k_x3 = jax.random.split(key, 7)

    N, F_g, F_l, F_int, H, W = 2, 4, 4, 8, 16, 16
    params = make_params(k_p, F_g, F_l, F_int)
    folded = fold_attention_gate_params(params)

    # Case 1: HW a multiple of 128.
    g = jax.random.normal(k_g, (N, F_g, H, W), jnp.float32)
    x = jax.random.normal(k_x, (N, F_l, H, W), jnp.float32)
    out = jax.block_until_ready(attention_gate(g, x, folded))
    ref = attention_gate_ref(g, x, params)
    assert out.shape == (N, F_l, H, W)
    assert jnp.allclose(out, ref, atol=1e-5, rtol=1e-5), "mismatch vs reference"

    # Case 2: HW not a multiple of 128 (partial lane tile, masked stores).
    H2 = W2 = 10
    g2 = jax.random.normal(k_g2, (N, F_g, H2, W2), jnp.float32)
    x2 = jax.random.normal(k_x2, (N, F_l, H2, W2), jnp.float32)
    out2 = jax.block_until_ready(attention_gate(g2, x2, folded))
    ref2 = attention_gate_ref(g2, x2, params)
    assert out2.shape == (N, F_l, H2, W2)
    assert jnp.allclose(out2, ref2, atol=1e-5, rtol=1e-5), "mismatch (partial tile)"

    # Case 3: larger batch so the batch-folded block path (nb > 1) is exercised.
    N3 = 4
    g3 = jax.random.normal(k_g3, (N3, F_g, H, W), jnp.float32)
    x3 = jax.random.normal(k_x3, (N3, F_l, H, W), jnp.float32)
    out3 = jax.block_until_ready(attention_gate(g3, x3, folded))
    ref3 = attention_gate_ref(g3, x3, params)
    assert out3.shape == (N3, F_l, H, W)
    assert jnp.allclose(out3, ref3, atol=1e-5, rtol=1e-5), "mismatch (batched block)"

    print("KERNEL_OK")
</pallas_src>

<mosaic_0001>
module attributes {stable_mosaic.version = 11 : i64} {
  func.func @attention_gate_kernel(%arg0: i32, %arg1: i32, %arg2: memref<1x4x256xf32, #tpu.memory_space<vmem>>, %arg3: memref<1x4x256xf32, #tpu.memory_space<vmem>>, %arg4: memref<8x4xf32, #tpu.memory_space<vmem>>, %arg5: memref<8x4xf32, #tpu.memory_space<vmem>>, %arg6: memref<8x1xf32, #tpu.memory_space<vmem>>, %arg7: memref<8x1xf32, #tpu.memory_space<vmem>>, %arg8: memref<1x1xf32, #tpu.memory_space<vmem>>, %arg9: memref<1x4x256xf32, #tpu.memory_space<vmem>>) attributes {dimension_semantics = [#tpu.dimension_semantics<parallel>, #tpu.dimension_semantics<parallel>], iteration_bounds = array<i64: 2, 1>, scalar_prefetch = 0 : i64, scratch_operands = 0 : i64, tpu.core_type = #tpu.core_type<tc>, window_params = [{transform_indices = @transform_0, window_bounds = array<i64: 1, 4, 256>}, {transform_indices = @transform_1, window_bounds = array<i64: 1, 4, 256>}, {pipeline_mode = #tpu.pipeline_mode<synchronous>, transform_indices = @transform_2, window_bounds = array<i64: 8, 4>}, {pipeline_mode = #tpu.pipeline_mode<synchronous>, transform_indices = @transform_3, window_bounds = array<i64: 8, 4>}, {pipeline_mode = #tpu.pipeline_mode<synchronous>, transform_indices = @transform_4, window_bounds = array<i64: 8, 1>}, {pipeline_mode = #tpu.pipeline_mode<synchronous>, transform_indices = @transform_5, window_bounds = array<i64: 8, 1>}, {pipeline_mode = #tpu.pipeline_mode<synchronous>, transform_indices = @transform_6, window_bounds = array<i64: 1, 1>}, {transform_indices = @transform_7, window_bounds = array<i64: 1, 4, 256>}]} {
    %c0 = arith.constant 0 : index
    %c0_0 = arith.constant 0 : index
    %0 = vector.load %arg4[%c0, %c0_0] : memref<8x4xf32, #tpu.memory_space<vmem>>, vector<8x4xf32>
    %c0_1 = arith.constant 0 : index
    %c0_2 = arith.constant 0 : index
    %1 = vector.load %arg5[%c0_1, %c0_2] : memref<8x4xf32, #tpu.memory_space<vmem>>, vector<8x4xf32>
    %c0_3 = arith.constant 0 : index
    %c0_4 = arith.constant 0 : index
    %2 = vector.load %arg6[%c0_3, %c0_4] : memref<8x1xf32, #tpu.memory_space<vmem>>, vector<8x1xf32>
    %c0_5 = arith.constant 0 : index
    %c0_6 = arith.constant 0 : index
    %3 = vector.load %arg7[%c0_5, %c0_6] : memref<8x1xf32, #tpu.memory_space<vmem>>, vector<8x1xf32>
    %c0_7 = arith.constant 0 : index
    %c0_8 = arith.constant 0 : index
    %4 = vector.load %arg8[%c0_7, %c0_8] : memref<1x1xf32, #tpu.memory_space<vmem>>, vector<1x1xf32>
    %c0_9 = arith.constant 0 : index
    %c0_10 = arith.constant 0 : index
    %c0_11 = arith.constant 0 : index
    %5 = vector.load %arg2[%c0_9, %c0_10, %c0_11] : memref<1x4x256xf32, #tpu.memory_space<vmem>>, vector<1x4x256xf32>
    %6 = vector.shape_cast %5 : vector<1x4x256xf32> to vector<4x256xf32>
    %c0_12 = arith.constant 0 : index
    %c0_13 = arith.constant 0 : index
    %c0_14 = arith.constant 0 : index
    %7 = vector.load %arg3[%c0_12, %c0_13, %c0_14] : memref<1x4x256xf32, #tpu.memory_space<vmem>>, vector<1x4x256xf32>
    %8 = vector.shape_cast %7 : vector<1x4x256xf32> to vector<4x256xf32>
    %cst = arith.constant dense<0.000000e+00> : vector<8x256xf32>
    %9 = tpu.matmul %0, %6, %cst {dimension_numbers = #tpu.dot_dimension_numbers<[1], [0], [0], [1], [0, 0, 1, 1], [], []>} : vector<8x4xf32>, vector<4x256xf32>, vector<8x256xf32> -> vector<8x256xf32>
    %cst_15 = arith.constant dense<0.000000e+00> : vector<8x256xf32>
    %10 = tpu.matmul %1, %8, %cst_15 {dimension_numbers = #tpu.dot_dimension_numbers<[1], [0], [0], [1], [0, 0, 1, 1], [], []>} : vector<8x4xf32>, vector<4x256xf32>, vector<8x256xf32> -> vector<8x256xf32>
    %11 = arith.addf %9, %10 : vector<8x256xf32>
    %12 = vector.broadcast %2 : vector<8x1xf32> to vector<8x256xf32>
    %13 = arith.addf %11, %12 : vector<8x256xf32>
    %cst_16 = arith.constant 0.000000e+00 : f32
    %14 = vector.broadcast %cst_16 : f32 to vector<8x256xf32>
    %15 = arith.maximumf %13, %14 : vector<8x256xf32>
    %16 = vector.broadcast %3 : vector<8x1xf32> to vector<8x256xf32>
    %17 = arith.mulf %15, %16 : vector<8x256xf32>
    %cst_17 = arith.constant dense<0.000000e+00> : vector<256xf32>
    %18 = vector.multi_reduction <add>, %17, %cst_17 [0] : vector<8x256xf32> to vector<256xf32>
    %19 = vector.shape_cast %18 : vector<256xf32> to vector<1x256xf32>
    %20 = vector.broadcast %4 : vector<1x1xf32> to vector<1x256xf32>
    %21 = arith.addf %19, %20 : vector<1x256xf32>
    %22 = arith.negf %21 : vector<1x256xf32>
    %23 = math.exp %22 : vector<1x256xf32>
    %cst_18 = arith.constant 1.000000e+00 : f32
    %24 = vector.broadcast %cst_18 : f32 to vector<1x256xf32>
    %25 = arith.addf %24, %23 : vector<1x256xf32>
    %26 = arith.divf %24, %25 : vector<1x256xf32>
    %27 = vector.broadcast %26 : vector<1x256xf32> to vector<4x256xf32>
    %28 = arith.mulf %8, %27 : vector<4x256xf32>
    %c0_19 = arith.constant 0 : index
    %c0_20 = arith.constant 0 : index
    %c0_21 = arith.constant 0 : index
    %29 = vector.load %arg9[%c0_19, %c0_20, %c0_21] : memref<1x4x256xf32, #tpu.memory_space<vmem>>, vector<1x4x256xf32>
    %30 = vector.shape_cast %29 : vector<1x4x256xf32> to vector<4x256xf32>
    %31 = vector.shape_cast %28 : vector<4x256xf32> to vector<1x4x256xf32>
    tpu.vector_store %arg9[%c0_19, %c0_20, %c0_21], %31 {strides = array<i32>} : memref<1x4x256xf32, #tpu.memory_space<vmem>>, vector<1x4x256xf32>,
    return
  }
  func.func @transform_0(%arg0: i32, %arg1: i32) -> (i32, i32, i32) {
    %c0_i32 = arith.constant 0 : i32
    %c0_i32_0 = arith.constant 0 : i32
    return %arg0, %c0_i32, %arg1 : i32, i32, i32
  }
  func.func @transform_1(%arg0: i32, %arg1: i32) -> (i32, i32, i32) {
    %c0_i32 = arith.constant 0 : i32
    %c0_i32_0 = arith.constant 0 : i32
    return %arg0, %c0_i32, %arg1 : i32, i32, i32
  }
  func.func @transform_2(%arg0: i32, %arg1: i32) -> (i32, i32) {
    %c0_i32 = arith.constant 0 : i32
    %c0_i32_0 = arith.constant 0 : i32
    %c0_i32_1 = arith.constant 0 : i32
    return %c0_i32, %c0_i32_0 : i32, i32
  }
  func.func @transform_3(%arg0: i32, %arg1: i32) -> (i32, i32) {
    %c0_i32 = arith.constant 0 : i32
    %c0_i32_0 = arith.constant 0 : i32
    %c0_i32_1 = arith.constant 0 : i32
    return %c0_i32, %c0_i32_0 : i32, i32
  }
  func.func @transform_4(%arg0: i32, %arg1: i32) -> (i32, i32) {
    %c0_i32 = arith.constant 0 : i32
    %c0_i32_0 = arith.constant 0 : i32
    %c0_i32_1 = arith.constant 0 : i32
    return %c0_i32, %c0_i32_0 : i32, i32
  }
  func.func @transform_5(%arg0: i32, %arg1: i32) -> (i32, i32) {
    %c0_i32 = arith.constant 0 : i32
    %c0_i32_0 = arith.constant 0 : i32
    %c0_i32_1 = arith.constant 0 : i32
    return %c0_i32, %c0_i32_0 : i32, i32
  }
  func.func @transform_6(%arg0: i32, %arg1: i32) -> (i32, i32) {
    %c0_i32 = arith.constant 0 : i32
    %c0_i32_0 = arith.constant 0 : i32
    %c0_i32_1 = arith.constant 0 : i32
    return %c0_i32, %c0_i32_0 : i32, i32
  }
  func.func @transform_7(%arg0: i32, %arg1: i32) -> (i32, i32, i32) {
    %c0_i32 = arith.constant 0 : i32
    %c0_i32_0 = arith.constant 0 : i32
    return %arg0, %c0_i32, %arg1 : i32, i32, i32
  }
}

</mosaic_0001>

<bundles_post_ra>
// kernel: _attention_gate_fwd.1
= control target key start
LH: loop header
LB: loop body
LE: loop exit
PB: predicated region body
PF: predicated region fallthrough
CT: control target
= control target key end

     0   :  { %s820_s26 = smov 0   ;;  %s822_s27 = smov 0   ;;  %s879_s0 = inlined_call_operand.vmem [shape: f32[2,4,256], index: 0, kind: input, shape index: {}]   ;;  %s880_s1 = inlined_call_operand.vmem [shape: f32[2,4,256], index: 1, kind: input, shape index: {}]   ;;  %s881_s2 = inlined_call_operand.vmem [shape: f32[8,4], index: 2, kind: input, shape index: {}]   ;;  %s882_s3 = inlined_call_operand.vmem [shape: f32[8,4], index: 3, kind: input, shape index: {}]   ;;  %s883_s4 = inlined_call_operand.vmem [shape: f32[8,1], index: 4, kind: input, shape index: {}]   ;;  %s884_s5 = inlined_call_operand.vmem [shape: f32[8,1], index: 5, kind: input, shape index: {}]   ;;  %s885_s6 = inlined_call_operand.<no memory space> [shape: f32[1,1], index: 6, kind: input, shape index: {}]   ;;  %s886_s7 = inlined_call_operand.vmem [shape: f32[2,4,256], index: 7, kind: output, shape index: {}]  }
   0x1   :  { %v12_v0 = vstv %s885_s6  ;;  %s824_s28 = smov 0  }
   0x2   :  { %13 = vst [vmem:[#allocation2] sm:$0x1] %v12_v0 }
   0x3 LB: > { %s31_s6 = sadd.s32 1, %s769_s27  ;;  %p691_p0 = scmp.ge.s32.totalorder %s773_s28, 1  ;;  %s773_s28 = sphi %s824_s28, %s19_s28   ;;  %s769_s27 = sphi %s822_s27, %s888_s27   ;;  %s765_s26 = sphi %s820_s26, %s887_s26  }
   0x4   : > { %p33_p1 = scmp.ge.s32.totalorder %s31_s6, 2  ;;  %p277_p2 = scmp.lt.s32.totalorder %s773_s28, 3 }
   0x6   : > { %s890_s6 = smov (%p33_p1, %s31_s6), 0  ;;  %p278_p3 = pnand %p691_p0, %p277_p2 }
   0x7   : > { %p327_p4 = scmp.lt.s32.totalorder (!%p278_p3), %s765_s26, 1  ;;  %v775_v1 = vmov (!%p278_p3), 0.0   ;;  %v358_v2 = vld [vmem:[%s883_s4] sm:$0xff] (!%p278_p3)  ;;  %v776_v4 = vmov (!%p278_p3), 0   ;;  %vm369_vm0 = vcmask (!%p278_p3), 1043456   ;;  %vm365_vm1 = vcmask (!%p278_p3), 31744  }
   0x8   : > { %281 = sbr.rel (%p278_p3) target bundleno = 290 (0x122), region = 48  ;;  %438 = vmatprep.mubr.f32.mxu1 (!%p278_p3), %v775_v1  ;;  %518 = vmatprep.mubr.f32.mxu0 (!%p278_p3), %v775_v1  ;;  %v359_v5 = vld [vmem:[%s884_s5] sm:$0xff] (!%p278_p3)  ;;  %v558_v22 = vlaneseq (!%p278_p3) }
   0x9   : > { %v360_v3 = vld [vmem:[#allocation2] sm:$0x1] (!%p278_p3)  ;;  %739 = vset.pattern.permute.xlu0 (!%p278_p3), %v776_v4  ;;  %740 = vset.pattern.permute.xlu1 (!%p278_p3), %v776_v4 }
   0xa   : > { %527 = vperm.xlu0 (!%p278_p3), %739, %v358_v2   ;;  %555 = vperm.xlu1 (!%p278_p3), %740, %v360_v3   ;;  %v357_v10 = vld [vmem:[%s882_s3] sm:$0xff] (!%p278_p3)  ;;  %v559_v28 = vshrl.u32 (!%p278_p3), %v558_v22, 7 }
   0xb   : > { %v356_v11 = vld [vmem:[%s881_s2] sm:$0xff] (!%p278_p3) }
   0xc   : > { %v560_v33 = vsub.s32 (!%p278_p3), 0, %v559_v28 }
   0xe   : > { %536 = vperm.xlu0 (!%p278_p3), %739, %v359_v5  }
   0xf   : > { %s892_s26 = smov (!%p327_p4, %s765_s26), 1 }
  0x10   : > { %s841_s8 = sshll.u32 %s892_s26, 3 }
  0x11   : > { %s344_s13 = scalar_lea.vmem %s880_s1, %s841_s8  ;;  %s334_s16 = scalar_lea.vmem %s879_s0, %s841_s8 }
  0x12   : > { %v850_v6 = vld [vmem:[%s344_s13] sm:$0xff]  ;;  %s354_s23 = scalar_lea.vmem %s886_s7, %s841_s8 }
  0x13   : > { %v364_v7 = vcombine.high %v850_v6, %v850_v6  ;;  %v361_v8 = vld [vmem:[%s334_s16] sm:$0xff] }
  0x14   : > { %v446_v9 = vcombine.high %v361_v8, %v361_v8 }
  0x15   : > { %698 = vmatprep.subr.msk.mxu1 %vm369_vm0, %v364_v7 }
  0x16   : > { %701 = vmatprep.subr.msk.mxu0 %vm369_vm0, %v446_v9  ;;  %699 = vmatpush1.msk.msra.mxu1 %vm369_vm0, %v850_v6 }
  0x17   : > { %702 = vmatpush1.msk.msra.mxu0 %vm369_vm0, %v361_v8  ;;  %700 = vmatmul.mubr.msk.f32.vlgmr.msra.gmra.mrb[0].mxu1 %vm365_vm1, %v357_v10 }
  0x18   : > { %703 = vmatmul.mubr.msk.f32.vlgmr.msra.gmra.mrb[0].mxu0 %vm365_vm1, %v356_v11 }
  0x89   : > { %v528_v12 = vpop.permute.xlu0 %527  ;;  %v556_v35 = vpop.permute.xlu1 %555 }
  0x8a   : > { %v561_v39 = vrot.slane %v556_v35, %v560_v33 }
  0x8d   : > { %v537_v23 = vpop.permute.xlu0 %536 }
  0xea   : > { %v440_v13 = vpop.f32.mrb[0].mxu1 }
  0xeb   : > { %v520_v14 = vpop.f32.mrb[0].mxu0  ;;  %v442_v15 = vpop.f32.mrb[1].mxu1 }
  0xec   : > { %v521_v16 = vadd.f32 %v520_v14, %v440_v13  ;;  %v522_v17 = vpop.f32.mrb[1].mxu0 }
  0xed   : > { %v523_v18 = vadd.f32 %v522_v17, %v442_v15 }
  0xee   : > { %v530_v19 = vadd.f32 %v528_v12, %v521_v16 }
  0xef   : > { %v531_v20 = vadd.f32 %v528_v12, %v523_v18 }
  0xf0   : > { %v532_v21 = vmax.f32 %v530_v19, 0.0 }
  0xf1   : > { %v533_v24 = vmax.f32 %v531_v20, 0.0 }
  0xf2   : > { %v539_v25 = vmul.f32 %v537_v23, %v532_v21 }
  0xf3   : > { %v540_v26 = vmul.f32 %v537_v23, %v533_v24 }
  0xf4   : > { %v541_v27 = vrot.slane %v539_v25, 4 }
  0xf5   : > { %v547_v29 = vrot.slane %v540_v26, 4 }
  0xf6   : > { %v542_v30 = vadd.f32 %v541_v27, %v539_v25 }
  0xf7   : > { %v548_v31 = vadd.f32 %v547_v29, %v540_v26 }
  0xf8   : > { %v543_v32 = vrot.slane %v542_v30, 2 }
  0xf9   : > { %v549_v34 = vrot.slane %v548_v31, 2 }
  0xfa   : > { %v544_v36 = vadd.f32 %v543_v32, %v542_v30 }
  0xfb   : > { %v550_v37 = vadd.f32 %v549_v34, %v548_v31 }
  0xfc   : > { %v545_v38 = vrot.slane %v544_v36, 1 }
  0xfd   : > { %v551_v40 = vrot.slane %v550_v37, 1 }
  0xfe   : > { %v546_v41 = vadd.f32 %v545_v38, %v544_v36 }
  0xff   : > { %v552_v42 = vadd.f32 %v551_v40, %v550_v37 }
 0x100   : > { %v562_v43 = vadd.f32 %v561_v39, %v546_v41 }
 0x101   : > { %v563_v44 = vadd.f32 %v561_v39, %v552_v42 }
 0x102   : > { %v704_v45 = vmul.f32 -1.442695, %v562_v43 }
 0x103   : > { %v705_v46 = vmul.f32 -1.442695, %v563_v44 }
 0x104   : > { %743 = vpow2.f32 %v704_v45 }
 0x105   : > { %745 = vpow2.f32 %v705_v46 }
 0x10e   : > { %v744_v47 = vpop.eup %743 }
 0x10f   : > { %v746_v48 = vpop.eup %745  ;;  %v570_v49 = vadd.f32 1.0, %v744_v47 }
 0x110   : > { %v571_v50 = vadd.f32 1.0, %v746_v48 }
 0x111   : > { %747 = vrcp.f32 %v570_v49 }
 0x112   : > { %749 = vrcp.f32 %v571_v50 }
 0x11b   : > { %v748_v51 = vpop.eup %747 }
 0x11c   : > { %v750_v52 = vpop.eup %749 }
 0x11d   : > { %v578_v53 = vcombine.low %v748_v51, %v750_v52 }
 0x11f   : > { %v580_v54 = vmul.f32 %v578_v53, %v850_v6 }
 0x121   : > { %581 = vst [vmem:[%s354_s23] sm:$0xff] %v580_v54 }
 0x122 PF: > { %s19_s28 = sadd.s32 1, %s773_s28   ;;  %s887_s26 = smov %s769_s27 }
 0x123   : > { %p16_p5 = scmp.ge.s32.totalorder %s19_s28, 4   ;;  %s888_s27 = smov %s890_s6 }
 0x125   :  { %18 = sbr.rel (!%p16_p5) target bundleno = 3 (0x3), region = 81 }

</bundles_post_ra>
